<compile_context>
chip_gen: v5e
topology: v5e:2x2
jax: 0.10.0
libtpu: 0.0.40
codegen_flags: <defaults>
</compile_context>

<pallas_src>
import functools

import jax
import jax.numpy as jnp
from jax import lax
from jax.experimental import pallas as pl
from jax.experimental.pallas import tpu as pltpu

BN_EPS = 1e-5  # PyTorch BatchNorm2d default


# ----------------------------------------------------------------------------
# Kernel: fused conv3x3 + BatchNorm(training stats) + ReLU for the whole batch
# ----------------------------------------------------------------------------
def conv_bn_relu_kernel(x_ref, w_ref, r_ref, rt_ref, bias_ref, gamma_ref,
                        beta_ref, y_ref, *, n_batch, height, width, cout, eps):
    """
    x_ref    : (N, H+2, (W+2)*Cin)    zero-padded input, (W, Cin) flattened onto lanes
    w_ref    : (3, (W+2)*Cin, W*Cout) block-banded weights (one band per kernel row dy)
    r_ref    : (W*Cout, Cout)         0/1 matrix: lane -> channel reduction
    rt_ref   : (Cout, W*Cout)         0/1 matrix: channel -> lane broadcast
    bias_ref, gamma_ref, beta_ref : (1, W*Cout)  per-lane tiled parameters
    y_ref    : (N*H, W*Cout)          lane-dense output
    """
    wc = width * cout
    bias = bias_ref[...]                       # hoisted, used once per batch element

    # --- conv: 3 block-banded MXU matmuls per batch element (lane axis = W*Cout) ---
    accs = []
    for n in range(n_batch):
        acc = jnp.zeros((height, wc), jnp.float32)
        for dy in range(3):
            acc = acc + jnp.dot(x_ref[n, dy:dy + height, :], w_ref[dy],
                                preferred_element_type=jnp.float32)
        accs.append(acc + bias)

    # --- BatchNorm statistics over (N, H, W): two-pass, f32, biased variance ---
    count = jnp.float32(n_batch * height * width)
    lane_sum = jnp.zeros((1, wc), jnp.float32)
    for acc in accs:
        lane_sum = lane_sum + jnp.sum(acc, axis=0, keepdims=True)
    mean_c = jnp.dot(lane_sum, r_ref[...],
                     preferred_element_type=jnp.float32) / count       # (1, Cout)
    mean_l = jnp.dot(mean_c, rt_ref[...],
                     preferred_element_type=jnp.float32)                # (1, W*Cout)

    lane_ssq = jnp.zeros((1, wc), jnp.float32)
    for acc in accs:
        d = acc - mean_l
        lane_ssq = lane_ssq + jnp.sum(d * d, axis=0, keepdims=True)
    var_c = jnp.dot(lane_ssq, r_ref[...],
                    preferred_element_type=jnp.float32) / count         # (1, Cout)
    inv_std_l = jnp.dot(lax.rsqrt(var_c + eps), rt_ref[...],
                        preferred_element_type=jnp.float32)             # (1, W*Cout)

    scale_l = gamma_ref[...] * inv_std_l
    shift_l = beta_ref[...] - mean_l * scale_l

    # --- fused affine + ReLU, full-lane (128-wide) stores ---
    for n in range(n_batch):
        y_ref[n * height:(n + 1) * height, :] = jnp.maximum(
            accs[n] * scale_l + shift_l, 0.0)


# ----------------------------------------------------------------------------
# Wrapper-side (one-time) parameter repacking helpers
# ----------------------------------------------------------------------------
def _build_banded_weight(w_hwio, width):
    """(3, 3, Cin, Cout) HWIO -> (3, (W+2)*Cin, W*Cout) block-banded over W."""
    kh, kw, cin, cout = w_hwio.shape
    u = jnp.arange(width + 2)
    w = jnp.arange(width)
    dx = jnp.arange(kw)
    # mask[dx, u, w] = 1 iff padded column u feeds output column w through tap dx
    mask = (u[None, :, None] == w[None, None, :] + dx[:, None, None]).astype(jnp.float32)
    wb = jnp.einsum("xuw,yxio->yuiwo", mask, w_hwio.astype(jnp.float32))
    return wb.reshape(kh, (width + 2) * cin, width * cout)


def _build_reduce_mats(width, cout):
    """0/1 matrices mapping lane index w*Cout+co <-> channel co."""
    lane = jnp.arange(width * cout)
    r = (lane[:, None] % cout == jnp.arange(cout)[None, :]).astype(jnp.float32)
    return r, r.T


# ----------------------------------------------------------------------------
# Forward
# ----------------------------------------------------------------------------
def single_conv_forward(x_nchw, params):
    n, cin, h, w = x_nchw.shape
    w_hwio = params["w"].astype(jnp.float32)
    cout = w_hwio.shape[-1]
    wc = w * cout
    kcin = (w + 2) * cin

    # NCHW -> NHWC, zero-pad H/W by 1, flatten (W, Cin) onto the lane axis.
    # (transpose + pad + reshape fuse into a single XLA copy.)
    x = jnp.transpose(x_nchw.astype(jnp.float32), (0, 2, 3, 1))
    x = jnp.pad(x, ((0, 0), (1, 1), (1, 1), (0, 0)))
    x = x.reshape(n, h + 2, kcin)

    wb = _build_banded_weight(w_hwio, w)
    r_mat, rt_mat = _build_reduce_mats(w, cout)
    bias_l = jnp.tile(params["b"].reshape(1, cout).astype(jnp.float32), (1, w))
    gamma_l = jnp.tile(params["gamma"].reshape(1, cout).astype(jnp.float32), (1, w))
    beta_l = jnp.tile(params["beta"].reshape(1, cout).astype(jnp.float32), (1, w))

    kernel = functools.partial(conv_bn_relu_kernel, n_batch=n, height=h,
                               width=w, cout=cout, eps=BN_EPS)

    y = pl.pallas_call(
        kernel,
        out_shape=jax.ShapeDtypeStruct((n * h, wc), jnp.float32),
        grid_spec=pltpu.PrefetchScalarGridSpec(
            num_scalar_prefetch=0,
            grid=(1,),
            in_specs=[
                pl.BlockSpec((n, h + 2, kcin), lambda i: (0, 0, 0)),
                pl.BlockSpec((3, kcin, wc), lambda i: (0, 0, 0)),
                pl.BlockSpec((wc, cout), lambda i: (0, 0)),
                pl.BlockSpec((cout, wc), lambda i: (0, 0)),
                pl.BlockSpec((1, wc), lambda i: (0, 0)),
                pl.BlockSpec((1, wc), lambda i: (0, 0)),
                pl.BlockSpec((1, wc), lambda i: (0, 0)),
            ],
            out_specs=pl.BlockSpec((n * h, wc), lambda i: (0, 0)),
        ),
        compiler_params=pltpu.CompilerParams(
            dimension_semantics=("arbitrary",)),
    )(x, wb, r_mat, rt_mat, bias_l, gamma_l, beta_l)

    # (N*H, W*Cout) -> NHWC -> NCHW (match PyTorch output layout)
    y = y.reshape(n, h, w, cout)
    return jnp.transpose(y, (0, 3, 1, 2))


single_conv_forward_jit = jax.jit(single_conv_forward)


# ----------------------------------------------------------------------------
# Pure-JAX reference (correctness sanity check)
# ----------------------------------------------------------------------------
def ref_forward(x_nchw, params, eps=BN_EPS):
    x = jnp.transpose(x_nchw.astype(jnp.float32), (0, 2, 3, 1))
    h = lax.conv_general_dilated(
        x, params["w"].astype(jnp.float32), window_strides=(1, 1), padding="SAME",
        dimension_numbers=("NHWC", "HWIO", "NHWC")) + params["b"]
    mean = jnp.mean(h, axis=(0, 1, 2))
    var = jnp.mean((h - mean) ** 2, axis=(0, 1, 2))   # biased var (BN training mode)
    hn = (h - mean) * lax.rsqrt(var + eps) * params["gamma"] + params["beta"]
    return jnp.transpose(jnp.maximum(hn, 0.0), (0, 3, 1, 2))


# ----------------------------------------------------------------------------
# Main
# ----------------------------------------------------------------------------
if __name__ == "__main__":
    key = jax.random.PRNGKey(0)
    N, CH_IN, CH_OUT, H, W = 2, 4, 8, 16, 16

    keys = jax.random.split(key, 5)
    params = {
        # conv weight generated in PyTorch layout (Cout, Cin, 3, 3) then -> HWIO
        "w": jnp.transpose(
            jax.random.normal(keys[0], (CH_OUT, CH_IN, 3, 3), jnp.float32) * 0.1,
            (2, 3, 1, 0)),
        "b": jax.random.normal(keys[1], (CH_OUT,), jnp.float32) * 0.1,
        "gamma": 1.0 + 0.1 * jax.random.normal(keys[2], (CH_OUT,), jnp.float32),
        "beta": 0.1 * jax.random.normal(keys[3], (CH_OUT,), jnp.float32),
    }
    x = jax.random.normal(keys[4], (N, CH_IN, H, W), jnp.float32)

    out = jax.block_until_ready(single_conv_forward_jit(x, params))
    ref = jax.block_until_ready(ref_forward(x, params))

    assert out.shape == (N, CH_OUT, H, W)
    max_err = float(jnp.max(jnp.abs(out - ref)))
    assert jnp.allclose(out, ref, atol=1e-4, rtol=1e-4), max_err

    print("KERNEL_OK")
</pallas_src>

<mosaic_0001>
module attributes {stable_mosaic.version = 11 : i64} {
  func.func @conv_bn_relu_kernel(%arg0: i32, %arg1: memref<2x18x72xf32, #tpu.memory_space<vmem>>, %arg2: memref<3x72x128xf32, #tpu.memory_space<vmem>>, %arg3: memref<128x8xf32, #tpu.memory_space<vmem>>, %arg4: memref<8x128xf32, #tpu.memory_space<vmem>>, %arg5: memref<1x128xf32, #tpu.memory_space<vmem>>, %arg6: memref<1x128xf32, #tpu.memory_space<vmem>>, %arg7: memref<1x128xf32, #tpu.memory_space<vmem>>, %arg8: memref<32x128xf32, #tpu.memory_space<vmem>>) attributes {dimension_semantics = [#tpu.dimension_semantics<arbitrary>], iteration_bounds = array<i64: 1>, scalar_prefetch = 0 : i64, scratch_operands = 0 : i64, tpu.core_type = #tpu.core_type<tc>, window_params = [{pipeline_mode = #tpu.pipeline_mode<synchronous>, transform_indices = @transform_0, window_bounds = array<i64: 2, 18, 72>}, {pipeline_mode = #tpu.pipeline_mode<synchronous>, transform_indices = @transform_1, window_bounds = array<i64: 3, 72, 128>}, {pipeline_mode = #tpu.pipeline_mode<synchronous>, transform_indices = @transform_2, window_bounds = array<i64: 128, 8>}, {pipeline_mode = #tpu.pipeline_mode<synchronous>, transform_indices = @transform_3, window_bounds = array<i64: 8, 128>}, {pipeline_mode = #tpu.pipeline_mode<synchronous>, transform_indices = @transform_4, window_bounds = array<i64: 1, 128>}, {pipeline_mode = #tpu.pipeline_mode<synchronous>, transform_indices = @transform_5, window_bounds = array<i64: 1, 128>}, {pipeline_mode = #tpu.pipeline_mode<synchronous>, transform_indices = @transform_6, window_bounds = array<i64: 1, 128>}, {pipeline_mode = #tpu.pipeline_mode<synchronous>, transform_indices = @transform_7, window_bounds = array<i64: 32, 128>}]} {
    %c0 = arith.constant 0 : index
    %c0_0 = arith.constant 0 : index
    %0 = vector.load %arg5[%c0, %c0_0] : memref<1x128xf32, #tpu.memory_space<vmem>>, vector<1x128xf32>
    %cst = arith.constant 0.000000e+00 : f32
    %1 = vector.broadcast %cst : f32 to vector<16x128xf32>
    %c0_1 = arith.constant 0 : index
    %c0_2 = arith.constant 0 : index
    %c0_3 = arith.constant 0 : index
    %2 = vector.load %arg1[%c0_1, %c0_2, %c0_3] : memref<2x18x72xf32, #tpu.memory_space<vmem>>, vector<1x16x72xf32>
    %3 = vector.shape_cast %2 : vector<1x16x72xf32> to vector<16x72xf32>
    %c0_4 = arith.constant 0 : index
    %c0_5 = arith.constant 0 : index
    %c0_6 = arith.constant 0 : index
    %4 = vector.load %arg2[%c0_4, %c0_5, %c0_6] : memref<3x72x128xf32, #tpu.memory_space<vmem>>, vector<1x72x128xf32>
    %5 = vector.shape_cast %4 : vector<1x72x128xf32> to vector<72x128xf32>
    %cst_7 = arith.constant dense<0.000000e+00> : vector<16x128xf32>
    %6 = tpu.matmul %3, %5, %cst_7 {dimension_numbers = #tpu.dot_dimension_numbers<[1], [0], [0], [1], [0, 0, 1, 1], [], []>} : vector<16x72xf32>, vector<72x128xf32>, vector<16x128xf32> -> vector<16x128xf32>
    %7 = arith.addf %1, %6 : vector<16x128xf32>
    %c0_8 = arith.constant 0 : index
    %c1 = arith.constant 1 : index
    %c0_9 = arith.constant 0 : index
    %8 = vector.load %arg1[%c0_8, %c1, %c0_9] : memref<2x18x72xf32, #tpu.memory_space<vmem>>, vector<1x16x72xf32>
    %9 = vector.shape_cast %8 : vector<1x16x72xf32> to vector<16x72xf32>
    %c1_10 = arith.constant 1 : index
    %c0_11 = arith.constant 0 : index
    %c0_12 = arith.constant 0 : index
    %10 = vector.load %arg2[%c1_10, %c0_11, %c0_12] : memref<3x72x128xf32, #tpu.memory_space<vmem>>, vector<1x72x128xf32>
    %11 = vector.shape_cast %10 : vector<1x72x128xf32> to vector<72x128xf32>
    %cst_13 = arith.constant dense<0.000000e+00> : vector<16x128xf32>
    %12 = tpu.matmul %9, %11, %cst_13 {dimension_numbers = #tpu.dot_dimension_numbers<[1], [0], [0], [1], [0, 0, 1, 1], [], []>} : vector<16x72xf32>, vector<72x128xf32>, vector<16x128xf32> -> vector<16x128xf32>
    %13 = arith.addf %7, %12 : vector<16x128xf32>
    %c0_14 = arith.constant 0 : index
    %c2 = arith.constant 2 : index
    %c0_15 = arith.constant 0 : index
    %14 = vector.load %arg1[%c0_14, %c2, %c0_15] : memref<2x18x72xf32, #tpu.memory_space<vmem>>, vector<1x16x72xf32>
    %15 = vector.shape_cast %14 : vector<1x16x72xf32> to vector<16x72xf32>
    %c2_16 = arith.constant 2 : index
    %c0_17 = arith.constant 0 : index
    %c0_18 = arith.constant 0 : index
    %16 = vector.load %arg2[%c2_16, %c0_17, %c0_18] : memref<3x72x128xf32, #tpu.memory_space<vmem>>, vector<1x72x128xf32>
    %17 = vector.shape_cast %16 : vector<1x72x128xf32> to vector<72x128xf32>
    %cst_19 = arith.constant dense<0.000000e+00> : vector<16x128xf32>
    %18 = tpu.matmul %15, %17, %cst_19 {dimension_numbers = #tpu.dot_dimension_numbers<[1], [0], [0], [1], [0, 0, 1, 1], [], []>} : vector<16x72xf32>, vector<72x128xf32>, vector<16x128xf32> -> vector<16x128xf32>
    %19 = arith.addf %13, %18 : vector<16x128xf32>
    %20 = vector.broadcast %0 : vector<1x128xf32> to vector<16x128xf32>
    %21 = arith.addf %19, %20 : vector<16x128xf32>
    %cst_20 = arith.constant 0.000000e+00 : f32
    %22 = vector.broadcast %cst_20 : f32 to vector<16x128xf32>
    %c1_21 = arith.constant 1 : index
    %c0_22 = arith.constant 0 : index
    %c0_23 = arith.constant 0 : index
    %23 = vector.load %arg1[%c1_21, %c0_22, %c0_23] : memref<2x18x72xf32, #tpu.memory_space<vmem>>, vector<1x16x72xf32>
    %24 = vector.shape_cast %23 : vector<1x16x72xf32> to vector<16x72xf32>
    %c0_24 = arith.constant 0 : index
    %c0_25 = arith.constant 0 : index
    %c0_26 = arith.constant 0 : index
    %25 = vector.load %arg2[%c0_24, %c0_25, %c0_26] : memref<3x72x128xf32, #tpu.memory_space<vmem>>, vector<1x72x128xf32>
    %26 = vector.shape_cast %25 : vector<1x72x128xf32> to vector<72x128xf32>
    %cst_27 = arith.constant dense<0.000000e+00> : vector<16x128xf32>
    %27 = tpu.matmul %24, %26, %cst_27 {dimension_numbers = #tpu.dot_dimension_numbers<[1], [0], [0], [1], [0, 0, 1, 1], [], []>} : vector<16x72xf32>, vector<72x128xf32>, vector<16x128xf32> -> vector<16x128xf32>
    %28 = arith.addf %22, %27 : vector<16x128xf32>
    %c1_28 = arith.constant 1 : index
    %c1_29 = arith.constant 1 : index
    %c0_30 = arith.constant 0 : index
    %29 = vector.load %arg1[%c1_28, %c1_29, %c0_30] : memref<2x18x72xf32, #tpu.memory_space<vmem>>, vector<1x16x72xf32>
    %30 = vector.shape_cast %29 : vector<1x16x72xf32> to vector<16x72xf32>
    %c1_31 = arith.constant 1 : index
    %c0_32 = arith.constant 0 : index
    %c0_33 = arith.constant 0 : index
    %31 = vector.load %arg2[%c1_31, %c0_32, %c0_33] : memref<3x72x128xf32, #tpu.memory_space<vmem>>, vector<1x72x128xf32>
    %32 = vector.shape_cast %31 : vector<1x72x128xf32> to vector<72x128xf32>
    %cst_34 = arith.constant dense<0.000000e+00> : vector<16x128xf32>
    %33 = tpu.matmul %30, %32, %cst_34 {dimension_numbers = #tpu.dot_dimension_numbers<[1], [0], [0], [1], [0, 0, 1, 1], [], []>} : vector<16x72xf32>, vector<72x128xf32>, vector<16x128xf32> -> vector<16x128xf32>
    %34 = arith.addf %28, %33 : vector<16x128xf32>
    %c1_35 = arith.constant 1 : index
    %c2_36 = arith.constant 2 : index
    %c0_37 = arith.constant 0 : index
    %35 = vector.load %arg1[%c1_35, %c2_36, %c0_37] : memref<2x18x72xf32, #tpu.memory_space<vmem>>, vector<1x16x72xf32>
    %36 = vector.shape_cast %35 : vector<1x16x72xf32> to vector<16x72xf32>
    %c2_38 = arith.constant 2 : index
    %c0_39 = arith.constant 0 : index
    %c0_40 = arith.constant 0 : index
    %37 = vector.load %arg2[%c2_38, %c0_39, %c0_40] : memref<3x72x128xf32, #tpu.memory_space<vmem>>, vector<1x72x128xf32>
    %38 = vector.shape_cast %37 : vector<1x72x128xf32> to vector<72x128xf32>
    %cst_41 = arith.constant dense<0.000000e+00> : vector<16x128xf32>
    %39 = tpu.matmul %36, %38, %cst_41 {dimension_numbers = #tpu.dot_dimension_numbers<[1], [0], [0], [1], [0, 0, 1, 1], [], []>} : vector<16x72xf32>, vector<72x128xf32>, vector<16x128xf32> -> vector<16x128xf32>
    %40 = arith.addf %34, %39 : vector<16x128xf32>
    %41 = vector.broadcast %0 : vector<1x128xf32> to vector<16x128xf32>
    %42 = arith.addf %40, %41 : vector<16x128xf32>
    %cst_42 = arith.constant 0.000000e+00 : f32
    %43 = vector.broadcast %cst_42 : f32 to vector<1x128xf32>
    %cst_43 = arith.constant dense<0.000000e+00> : vector<128xf32>
    %44 = vector.multi_reduction <add>, %21, %cst_43 [0] : vector<16x128xf32> to vector<128xf32>
    %45 = vector.shape_cast %44 : vector<128xf32> to vector<1x128xf32>
    %46 = arith.addf %43, %45 : vector<1x128xf32>
    %cst_44 = arith.constant dense<0.000000e+00> : vector<128xf32>
    %47 = vector.multi_reduction <add>, %42, %cst_44 [0] : vector<16x128xf32> to vector<128xf32>
    %48 = vector.shape_cast %47 : vector<128xf32> to vector<1x128xf32>
    %49 = arith.addf %46, %48 : vector<1x128xf32>
    %c0_45 = arith.constant 0 : index
    %c0_46 = arith.constant 0 : index
    %50 = vector.load %arg3[%c0_45, %c0_46] : memref<128x8xf32, #tpu.memory_space<vmem>>, vector<128x8xf32>
    %cst_47 = arith.constant dense<0.000000e+00> : vector<1x8xf32>
    %51 = tpu.matmul %49, %50, %cst_47 {dimension_numbers = #tpu.dot_dimension_numbers<[1], [0], [0], [1], [0, 0, 1, 1], [], []>} : vector<1x128xf32>, vector<128x8xf32>, vector<1x8xf32> -> vector<1x8xf32>
    %cst_48 = arith.constant 5.120000e+02 : f32
    %52 = vector.broadcast %cst_48 : f32 to vector<1x8xf32>
    %53 = arith.divf %51, %52 : vector<1x8xf32>
    %c0_49 = arith.constant 0 : index
    %c0_50 = arith.constant 0 : index
    %54 = vector.load %arg4[%c0_49, %c0_50] : memref<8x128xf32, #tpu.memory_space<vmem>>, vector<8x128xf32>
    %cst_51 = arith.constant dense<0.000000e+00> : vector<1x128xf32>
    %55 = tpu.matmul %53, %54, %cst_51 {dimension_numbers = #tpu.dot_dimension_numbers<[1], [0], [0], [1], [0, 0, 1, 1], [], []>} : vector<1x8xf32>, vector<8x128xf32>, vector<1x128xf32> -> vector<1x128xf32>
    %cst_52 = arith.constant 0.000000e+00 : f32
    %56 = vector.broadcast %cst_52 : f32 to vector<1x128xf32>
    %57 = vector.broadcast %55 : vector<1x128xf32> to vector<16x128xf32>
    %58 = arith.subf %21, %57 : vector<16x128xf32>
    %59 = arith.mulf %58, %58 : vector<16x128xf32>
    %cst_53 = arith.constant dense<0.000000e+00> : vector<128xf32>
    %60 = vector.multi_reduction <add>, %59, %cst_53 [0] : vector<16x128xf32> to vector<128xf32>
    %61 = vector.shape_cast %60 : vector<128xf32> to vector<1x128xf32>
    %62 = arith.addf %56, %61 : vector<1x128xf32>
    %63 = vector.broadcast %55 : vector<1x128xf32> to vector<16x128xf32>
    %64 = arith.subf %42, %63 : vector<16x128xf32>
    %65 = arith.mulf %64, %64 : vector<16x128xf32>
    %cst_54 = arith.constant dense<0.000000e+00> : vector<128xf32>
    %66 = vector.multi_reduction <add>, %65, %cst_54 [0] : vector<16x128xf32> to vector<128xf32>
    %67 = vector.shape_cast %66 : vector<128xf32> to vector<1x128xf32>
    %68 = arith.addf %62, %67 : vector<1x128xf32>
    %c0_55 = arith.constant 0 : index
    %c0_56 = arith.constant 0 : index
    %69 = vector.load %arg3[%c0_55, %c0_56] : memref<128x8xf32, #tpu.memory_space<vmem>>, vector<128x8xf32>
    %cst_57 = arith.constant dense<0.000000e+00> : vector<1x8xf32>
    %70 = tpu.matmul %68, %69, %cst_57 {dimension_numbers = #tpu.dot_dimension_numbers<[1], [0], [0], [1], [0, 0, 1, 1], [], []>} : vector<1x128xf32>, vector<128x8xf32>, vector<1x8xf32> -> vector<1x8xf32>
    %cst_58 = arith.constant 5.120000e+02 : f32
    %71 = vector.broadcast %cst_58 : f32 to vector<1x8xf32>
    %72 = arith.divf %70, %71 : vector<1x8xf32>
    %cst_59 = arith.constant 9.99999974E-6 : f32
    %73 = vector.broadcast %cst_59 : f32 to vector<1x8xf32>
    %74 = arith.addf %72, %73 : vector<1x8xf32>
    %75 = math.rsqrt %74 : vector<1x8xf32>
    %c0_60 = arith.constant 0 : index
    %c0_61 = arith.constant 0 : index
    %76 = vector.load %arg4[%c0_60, %c0_61] : memref<8x128xf32, #tpu.memory_space<vmem>>, vector<8x128xf32>
    %cst_62 = arith.constant dense<0.000000e+00> : vector<1x128xf32>
    %77 = tpu.matmul %75, %76, %cst_62 {dimension_numbers = #tpu.dot_dimension_numbers<[1], [0], [0], [1], [0, 0, 1, 1], [], []>} : vector<1x8xf32>, vector<8x128xf32>, vector<1x128xf32> -> vector<1x128xf32>
    %c0_63 = arith.constant 0 : index
    %c0_64 = arith.constant 0 : index
    %78 = vector.load %arg6[%c0_63, %c0_64] : memref<1x128xf32, #tpu.memory_space<vmem>>, vector<1x128xf32>
    %79 = arith.mulf %78, %77 : vector<1x128xf32>
    %c0_65 = arith.constant 0 : index
    %c0_66 = arith.constant 0 : index
    %80 = vector.load %arg7[%c0_65, %c0_66] : memref<1x128xf32, #tpu.memory_space<vmem>>, vector<1x128xf32>
    %81 = arith.mulf %55, %79 : vector<1x128xf32>
    %82 = arith.subf %80, %81 : vector<1x128xf32>
    %83 = vector.broadcast %79 : vector<1x128xf32> to vector<16x128xf32>
    %84 = arith.mulf %21, %83 : vector<16x128xf32>
    %85 = vector.broadcast %82 : vector<1x128xf32> to vector<16x128xf32>
    %86 = arith.addf %84, %85 : vector<16x128xf32>
    %cst_67 = arith.constant 0.000000e+00 : f32
    %87 = vector.broadcast %cst_67 : f32 to vector<16x128xf32>
    %88 = arith.maximumf %86, %87 : vector<16x128xf32>
    %c0_68 = arith.constant 0 : index
    %c0_69 = arith.constant 0 : index
    %89 = vector.load %arg8[%c0_68, %c0_69] : memref<32x128xf32, #tpu.memory_space<vmem>>, vector<16x128xf32>
    tpu.vector_store %arg8[%c0_68, %c0_69], %88 {strides = array<i32>} : memref<32x128xf32, #tpu.memory_space<vmem>>, vector<16x128xf32>,
    %90 = vector.broadcast %79 : vector<1x128xf32> to vector<16x128xf32>
    %91 = arith.mulf %42, %90 : vector<16x128xf32>
    %92 = vector.broadcast %82 : vector<1x128xf32> to vector<16x128xf32>
    %93 = arith.addf %91, %92 : vector<16x128xf32>
    %cst_70 = arith.constant 0.000000e+00 : f32
    %94 = vector.broadcast %cst_70 : f32 to vector<16x128xf32>
    %95 = arith.maximumf %93, %94 : vector<16x128xf32>
    %c16 = arith.constant 16 : index
    %c0_71 = arith.constant 0 : index
    %96 = vector.load %arg8[%c16, %c0_71] : memref<32x128xf32, #tpu.memory_space<vmem>>, vector<16x128xf32>
    tpu.vector_store %arg8[%c16, %c0_71], %95 {strides = array<i32>} : memref<32x128xf32, #tpu.memory_space<vmem>>, vector<16x128xf32>,
    return
  }
  func.func @transform_0(%arg0: i32) -> (i32, i32, i32) {
    %c0_i32 = arith.constant 0 : i32
    %c0_i32_0 = arith.constant 0 : i32
    %c0_i32_1 = arith.constant 0 : i32
    %c0_i32_2 = arith.constant 0 : i32
    return %c0_i32, %c0_i32_0, %c0_i32_1 : i32, i32, i32
  }
  func.func @transform_1(%arg0: i32) -> (i32, i32, i32) {
    %c0_i32 = arith.constant 0 : i32
    %c0_i32_0 = arith.constant 0 : i32
    %c0_i32_1 = arith.constant 0 : i32
    %c0_i32_2 = arith.constant 0 : i32
    return %c0_i32, %c0_i32_0, %c0_i32_1 : i32, i32, i32
  }
  func.func @transform_2(%arg0: i32) -> (i32, i32) {
    %c0_i32 = arith.constant 0 : i32
    %c0_i32_0 = arith.constant 0 : i32
    %c0_i32_1 = arith.constant 0 : i32
    return %c0_i32, %c0_i32_0 : i32, i32
  }
  func.func @transform_3(%arg0: i32) -> (i32, i32) {
    %c0_i32 = arith.constant 0 : i32
    %c0_i32_0 = arith.constant 0 : i32
    %c0_i32_1 = arith.constant 0 : i32
    return %c0_i32, %c0_i32_0 : i32, i32
  }
  func.func @transform_4(%arg0: i32) -> (i32, i32) {
    %c0_i32 = arith.constant 0 : i32
    %c0_i32_0 = arith.constant 0 : i32
    %c0_i32_1 = arith.constant 0 : i32
    return %c0_i32, %c0_i32_0 : i32, i32
  }
  func.func @transform_5(%arg0: i32) -> (i32, i32) {
    %c0_i32 = arith.constant 0 : i32
    %c0_i32_0 = arith.constant 0 : i32
    %c0_i32_1 = arith.constant 0 : i32
    return %c0_i32, %c0_i32_0 : i32, i32
  }
  func.func @transform_6(%arg0: i32) -> (i32, i32) {
    %c0_i32 = arith.constant 0 : i32
    %c0_i32_0 = arith.constant 0 : i32
    %c0_i32_1 = arith.constant 0 : i32
    return %c0_i32, %c0_i32_0 : i32, i32
  }
  func.func @transform_7(%arg0: i32) -> (i32, i32) {
    %c0_i32 = arith.constant 0 : i32
    %c0_i32_0 = arith.constant 0 : i32
    %c0_i32_1 = arith.constant 0 : i32
    return %c0_i32, %c0_i32_0 : i32, i32
  }
}

</mosaic_0001>

<bundles_post_ra>
// kernel: single_conv_forward.1
= control target key start
LH: loop header
LB: loop body
LE: loop exit
PB: predicated region body
PF: predicated region fallthrough
CT: control target
= control target key end

     0   :  { %vm50_vm0 = vcmask 588800   ;;  %vm316_vm2 = vcmask 64512   ;;  %s791_s1 = inlined_call_operand.vmem [shape: f32[3,72,128], index: 1, kind: input, shape index: {}]   ;;  %s792_s0 = inlined_call_operand.vmem [shape: f32[2,18,72], index: 0, kind: input, shape index: {}]   ;;  %s793_s4 = inlined_call_operand.vmem [shape: f32[1,128], index: 4, kind: input, shape index: {}]   ;;  %s794_s2 = inlined_call_operand.vmem [shape: f32[128,8], index: 2, kind: input, shape index: {}]   ;;  %s795_s3 = inlined_call_operand.vmem [shape: f32[8,128], index: 3, kind: input, shape index: {}]   ;;  %s796_s5 = inlined_call_operand.vmem [shape: f32[1,128], index: 5, kind: input, shape index: {}]   ;;  %s797_s6 = inlined_call_operand.vmem [shape: f32[1,128], index: 6, kind: input, shape index: {}]   ;;  %s798_s7 = inlined_call_operand.vmem [shape: f32[32,128], index: 7, kind: output, shape index: {}]  }
   0x1   :  { %v459_v0 = vld [vmem:[%s791_s1 + $0x88] sm:$0xff]  ;;  %v542_v1 = vld [vmem:[%s791_s1 + $0xd0] sm:$0xff]  ;;  %v547_v2 = vld [vmem:[%s791_s1 + $0x40] sm:$0xff] }
   0x2   :  { %64 = vmatpush.msra.mxu0 %v459_v0  ;;  %134 = vmatpush.msra.mxu2 %v542_v1  ;;  %v458_v3 = vld [vmem:[%s791_s1 + $0x80] sm:$0xff]  ;;  %v556_v4 = vld [vmem:[%s791_s1 + $0xc8] sm:$0xff]  ;;  %v561_v5 = vld [vmem:[%s791_s1 + $0x38] sm:$0xff] }
   0x3   :  { %93 = vmatpush.msra.mxu1 %v547_v2  ;;  %v457_v6 = vld [vmem:[%s791_s1 + $0x78] sm:$0xff]  ;;  %v570_v7 = vld [vmem:[%s791_s1 + $0xc0] sm:$0xff]  ;;  %175 = vmatpush.msra.mxu3 %v459_v0  ;;  %v576_v8 = vld [vmem:[%s791_s1 + $0x30] sm:$0xff] }
   0x4   :  { %65 = vmatpush.msra.mxu0 %v458_v3  ;;  %135 = vmatpush.msra.mxu2 %v556_v4  ;;  %v456_v9 = vld [vmem:[%s791_s1 + $0x70] sm:$0xff]  ;;  %v585_v10 = vld [vmem:[%s791_s1 + $0xb8] sm:$0xff]  ;;  %v34_v11 = vld [vmem:[%s791_s1 + $0x28] sm:$0xff] }
   0x5   :  { %94 = vmatpush.msra.mxu1 %v561_v5  ;;  %176 = vmatpush.msra.mxu3 %v458_v3  ;;  %v455_v12 = vld [vmem:[%s791_s1 + $0x68] sm:$0xff]  ;;  %v598_v13 = vld [vmem:[%s791_s1 + $0xb0] sm:$0xff]  ;;  %v33_v14 = vld [vmem:[%s791_s1 + $0x20] sm:$0xff] }
   0x6   :  { %66 = vmatpush.msra.mxu0 %v457_v6  ;;  %136 = vmatpush.msra.mxu2 %v570_v7  ;;  %v454_v15 = vld [vmem:[%s791_s1 + $0x60] sm:$0xff]  ;;  %v467_v16 = vld [vmem:[%s791_s1 + $0xa8] sm:$0xff]  ;;  %v32_v17 = vld [vmem:[%s791_s1 + $0x18] sm:$0xff] }
   0x7   :  { %95 = vmatpush.msra.mxu1 %v576_v8  ;;  %177 = vmatpush.msra.mxu3 %v457_v6  ;;  %v453_v18 = vld [vmem:[%s791_s1 + $0x58] sm:$0xff]  ;;  %v466_v19 = vld [vmem:[%s791_s1 + $0xa0] sm:$0xff]  ;;  %v31_v20 = vld [vmem:[%s791_s1 + $0x10] sm:$0xff] }
   0x8   :  { %67 = vmatpush.msra.mxu0 %v456_v9  ;;  %137 = vmatpush.msra.mxu2 %v585_v10  ;;  %v452_v21 = vld [vmem:[%s791_s1 + $0x50] sm:$0xff]  ;;  %v465_v22 = vld [vmem:[%s791_s1 + $0x98] sm:$0xff]  ;;  %v30_v23 = vld [vmem:[%s791_s1 + $0x8] sm:$0xff] }
   0x9   :  { %96 = vmatpush.msra.mxu1 %v34_v11  ;;  %178 = vmatpush.msra.mxu3 %v456_v9  ;;  %v451_v24 = vld [vmem:[%s791_s1 + $0x48] sm:$0xff]  ;;  %v464_v25 = vld [vmem:[%s791_s1 + $0x90] sm:$0xff]  ;;  %v29_v26 = vld [vmem:[%s791_s1] sm:$0xff] }
   0xa   :  { %68 = vmatpush.msra.mxu0 %v455_v12  ;;  %138 = vmatpush.msra.mxu2 %v598_v13  ;;  %v109_v27 = vld [vmem:[%s792_s0 + $0x2] sm:$0xff]  ;;  %v477_v30 = vld [vmem:[%s792_s0 + $0x19] sm:$0xff]  ;;  %v110_v31 = vld [vmem:[%s792_s0 + $0xa] sm:$0xff] }
   0xb   :  { %97 = vmatpush.msra.mxu1 %v33_v14  ;;  %179 = vmatpush.msra.mxu3 %v455_v12  ;;  %v27_v28 = vld [vmem:[%s792_s0] sm:$0xff]  ;;  %v28_v32 = vld [vmem:[%s792_s0 + $0x8] sm:$0xff]  ;;  %v475_v35 = vld [vmem:[%s792_s0 + $0x18] sm:$0xff] }
   0xc   :  { %69 = vmatpush.msra.mxu0 %v454_v15  ;;  %139 = vmatpush.msra.mxu2 %v467_v16  ;;  %v38_v29 = vld [vmem:[%s792_s0 + $0x1] sm:$0xff]  ;;  %v39_v33 = vld [vmem:[%s792_s0 + $0x9] sm:$0xff]  ;;  %v286_v39 = vld [vmem:[%s794_s2 + $0x78] sm:$0xff] }
   0xd   :  { %98 = vmatpush.msra.mxu1 %v32_v17  ;;  %180 = vmatpush.msra.mxu3 %v454_v15  ;;  %v478_v34 = vld [vmem:[%s792_s0 + $0x21] sm:$0xff]  ;;  %v285_v40 = vld [vmem:[%s794_s2 + $0x70] sm:$0xff]  ;;  %v282_v43 = vld [vmem:[%s794_s2 + $0x58] sm:$0xff] }
   0xe   :  { %70 = vmatpush.msra.mxu0 %v453_v18  ;;  %140 = vmatpush.msra.mxu2 %v466_v19  ;;  %v483_v36 = vld [vmem:[%s792_s0 + $0x1a] sm:$0xff]  ;;  %v484_v38 = vld [vmem:[%s792_s0 + $0x22] sm:$0xff]  ;;  %v281_v44 = vld [vmem:[%s794_s2 + $0x50] sm:$0xff] }
   0xf   :  { %99 = vmatpush.msra.mxu1 %v31_v20  ;;  %181 = vmatpush.msra.mxu3 %v453_v18  ;;  %v476_v37 = vld [vmem:[%s792_s0 + $0x20] sm:$0xff]  ;;  %v284_v41 = vld [vmem:[%s794_s2 + $0x68] sm:$0xff]  ;;  %v278_v48 = vld [vmem:[%s794_s2 + $0x38] sm:$0xff] }
  0x10   :  { %71 = vmatpush.msra.mxu0 %v452_v21  ;;  %141 = vmatpush.msra.mxu2 %v465_v22  ;;  %v283_v42 = vld [vmem:[%s794_s2 + $0x60] sm:$0xff]  ;;  %v280_v45 = vld [vmem:[%s794_s2 + $0x48] sm:$0xff]  ;;  %v277_v50 = vld [vmem:[%s794_s2 + $0x30] sm:$0xff] }
  0x11   :  { %100 = vmatpush.msra.mxu1 %v30_v23  ;;  %182 = vmatpush.msra.mxu3 %v452_v21  ;;  %v279_v46 = vld [vmem:[%s794_s2 + $0x40] sm:$0xff]  ;;  %v276_v51 = vld [vmem:[%s794_s2 + $0x28] sm:$0xff]  ;;  %v274_v54 = vld [vmem:[%s794_s2 + $0x18] sm:$0xff] }
  0x12   :  { %72 = vmatpush.msra.mxu0 %v451_v24  ;;  %142 = vmatpush.msra.mxu2 %v464_v25  ;;  %v275_v52 = vld [vmem:[%s794_s2 + $0x20] sm:$0xff]  ;;  %v273_v55 = vld [vmem:[%s794_s2 + $0x10] sm:$0xff]  ;;  %v272_v58 = vld [vmem:[%s794_s2 + $0x8] sm:$0xff] }
  0x13   :  { %101 = vmatpush.msra.mxu1 %v29_v26  ;;  %473 = vmatmul.msk.f32.vlgmr.msra.gmra.mxu2 %vm50_vm0, %v109_v27  ;;  %v271_v61 = vld [vmem:[%s794_s2] sm:$0xff] }
  0x14   :  { %204 = vmatpush.msrb.mxu0 %v547_v2  ;;  %462 = vmatmul.msk.f32.vlgmr.msra.gmra.mxu1 %vm50_vm0, %v27_v28 }
  0x15   :  { %460 = vmatmul.msk.f32.vlgmr.msra.gmra.mxu0 %vm50_vm0, %v38_v29  ;;  %235 = vmatpush.msrb.mxu1 %v542_v1  ;;  %v490_v1 = vld [vmem:[%s793_s4] ss:$0 sm:$0xff] }
  0x16   :  { %205 = vmatpush.msrb.mxu0 %v561_v5  ;;  %183 = vmatpush.msra.mxu3 %v451_v24 }
  0x17   :  { %236 = vmatpush.msrb.mxu1 %v556_v4  ;;  %479 = vmatmul.msk.f32.vlgmr.msra.gmra.mxu3 %vm50_vm0, %v477_v30  ;;  %v315_v4 = vld [vmem:[%s795_s3] sm:$0xff] }
  0x18   :  { %206 = vmatpush.msrb.mxu0 %v576_v8  ;;  %287 = vmatpush.msrb.mxu2 %v286_v39 }
  0x19   :  { %237 = vmatpush.msrb.mxu1 %v570_v7  ;;  %365 = vmatpush.msrb.mxu3 %v286_v39 }
  0x1a   :  { %207 = vmatpush.msrb.mxu0 %v34_v11  ;;  %288 = vmatpush.msrb.mxu2 %v285_v40 }
  0x1b   :  { %474 = vmatmul.msk.f32.gmra.mxu2 %vm50_vm0, %v110_v31  ;;  %238 = vmatpush.msrb.mxu1 %v585_v10 }
  0x1c   :  { %208 = vmatpush.msrb.mxu0 %v33_v14  ;;  %463 = vmatmul.msk.f32.gmra.mxu1 %vm50_vm0, %v28_v32  ;;  %v495_v32 = vmov 512.0  }
  0x1d   :  { %461 = vmatmul.msk.f32.gmra.mxu0 %vm50_vm0, %v39_v33  ;;  %239 = vmatpush.msrb.mxu1 %v598_v13  ;;  %491 = vrcp.f32 %v495_v32 }
  0x1e   :  { %209 = vmatpush.msrb.mxu0 %v32_v17  ;;  %366 = vmatpush.msrb.mxu3 %v285_v40 }
  0x1f   :  { %240 = vmatpush.msrb.mxu1 %v467_v16  ;;  %480 = vmatmul.msk.f32.gmra.mxu3 %vm50_vm0, %v478_v34 }
  0x20   :  { %210 = vmatpush.msrb.mxu0 %v31_v20  ;;  %289 = vmatpush.msrb.mxu2 %v284_v41 }
  0x21   :  { %241 = vmatpush.msrb.mxu1 %v466_v19  ;;  %367 = vmatpush.msrb.mxu3 %v284_v41 }
  0x22   :  { %211 = vmatpush.msrb.mxu0 %v30_v23  ;;  %290 = vmatpush.msrb.mxu2 %v283_v42 }
  0x23   :  { %242 = vmatpush.msrb.mxu1 %v465_v22  ;;  %368 = vmatpush.msrb.mxu3 %v283_v42  ;;  %v492_v33 = vpop.eup %491 }
  0x24   :  { %212 = vmatpush.msrb.mxu0 %v29_v26  ;;  %291 = vmatpush.msrb.mxu2 %v282_v43  ;;  %v308_v34 = vmul.f32 512.0, %v492_v33  ;;  %vm312_vm1 = vweird.f32 %v492_v33 }
  0x25   :  { %481 = vmatmul.msk.f32.vlgmr.msrb.gmra.mxu0 %vm50_vm0, %v475_v35  ;;  %243 = vmatpush.msrb.mxu1 %v464_v25 }
  0x26   :  { %485 = vmatmul.msk.f32.vlgmr.msrb.gmra.mxu1 %vm50_vm0, %v483_v36  ;;  %369 = vmatpush.msrb.mxu3 %v282_v43  ;;  %v309_v35 = vsub.f32 1.0, %v308_v34 }
  0x27   :  { %292 = vmatpush.msrb.mxu2 %v281_v44  ;;  %335 = vmatpush.msra.mxu1 %v315_v4 }
  0x28   :  { %370 = vmatpush.msrb.mxu3 %v281_v44  ;;  %415 = vmatpush.msra.mxu0 %v315_v4  ;;  %v310_v36 = vmul.f32 %v492_v33, %v309_v35 }
  0x29   :  { %293 = vmatpush.msrb.mxu2 %v280_v45 }
  0x2a   :  { %371 = vmatpush.msrb.mxu3 %v280_v45 }
  0x2b   :  { %294 = vmatpush.msrb.mxu2 %v279_v46 }
  0x2c   :  { %372 = vmatpush.msrb.mxu3 %v279_v46 }
  0x2d   :  { %482 = vmatmul.msk.f32.gmra.mxu0 %vm50_vm0, %v476_v37  ;;  %295 = vmatpush.msrb.mxu2 %v278_v48  ;;  %v311_v37 = vadd.f32 %v492_v33, %v310_v36 }
  0x2e   :  { %486 = vmatmul.msk.f32.gmra.mxu1 %vm50_vm0, %v484_v38  ;;  %373 = vmatpush.msrb.mxu3 %v278_v48 }
  0x2f   :  { %296 = vmatpush.msrb.mxu2 %v277_v50  ;;  %v313_v38 = vsel %vm312_vm1, %v492_v33, %v311_v37 }
  0x30   :  { %374 = vmatpush.msrb.mxu3 %v277_v50 }
  0x31   :  { %297 = vmatpush.msrb.mxu2 %v276_v51 }
  0x32   :  { %375 = vmatpush.msrb.mxu3 %v276_v51 }
  0x33   :  { %298 = vmatpush.msrb.mxu2 %v275_v52 }
  0x34   :  { %376 = vmatpush.msrb.mxu3 %v275_v52 }
  0x35   :  { %299 = vmatpush.msrb.mxu2 %v274_v54 }
  0x36   :  { %377 = vmatpush.msrb.mxu3 %v274_v54 }
  0x37   :  { %300 = vmatpush.msrb.mxu2 %v273_v55 }
  0x38   :  { %378 = vmatpush.msrb.mxu3 %v273_v55 }
  0x39   :  { %301 = vmatpush.msrb.mxu2 %v272_v58 }
  0x3a   :  { %379 = vmatpush.msrb.mxu3 %v272_v58 }
  0x3b   :  { %302 = vmatpush.msrb.mxu2 %v271_v61 }
  0x3c   :  { %380 = vmatpush.msrb.mxu3 %v271_v61 }
  0x91   :  { %v103_v47 = vpop.f32.mrf.mxu1 }
  0x92   :  { %v74_v49 = vpop.f32.mrf.mxu0 }
  0x93   :  { %v104_v59 = vadd.f32 %v103_v47, %v74_v49 }
  0x96   :  { %v144_v53 = vpop.f32.mrf.mxu2 }
  0x97   :  { %v150_v0 = vadd.f32 %v144_v53, %v104_v59 }
  0x99   :  { %v106_v57 = vpop.f32.mrf.mxu1  ;;  %v753_v6 = vadd.f32 %v490_v1, %v150_v0 }
  0x9a   :  { %v77_v56 = vpop.f32.mrf.mxu0  ;;  %v185_v63 = vpop.f32.mrf.mxu3 }
  0x9b   :  { %v107_v60 = vadd.f32 %v106_v57, %v77_v56 }
  0x9e   :  { %v147_v62 = vpop.f32.mrf.mxu2 }
  0x9f   :  { %v151_v2 = vadd.f32 %v147_v62, %v107_v60 }
  0xa1   :  { %v748_v3 = vadd.f32 %v490_v1, %v151_v2 }
  0xa2   :  { %v214_v5 = vpop.f32.mrf.mxu0  ;;  %v188_v10 = vpop.f32.mrf.mxu3 }
  0xa3   :  { %v245_v7 = vpop.f32.mrf.mxu1  ;;  %v255_v8 = vadd.f32 %v748_v3, %v753_v6  ;;  %v215_v9 = vadd.f32 %v214_v5, %v185_v63 }
  0xa5   :  { %v256_v11 = vrot.slane %v255_v8, 4  ;;  %v251_v13 = vadd.f32 %v245_v7, %v215_v9 }
  0xa7   :  { %v257_v16 = vadd.f32 %v256_v11, %v255_v8  ;;  %v757_v18 = vadd.f32 %v490_v1, %v251_v13 }
  0xa9   :  { %v258_v21 = vrot.slane %v257_v16, 2 }
  0xaa   :  { %v217_v12 = vpop.f32.mrf.mxu0 }
  0xab   :  { %v218_v14 = vadd.f32 %v217_v12, %v188_v10  ;;  %v248_v15 = vpop.f32.mrf.mxu1  ;;  %v259_v24 = vadd.f32 %v258_v21, %v257_v16 }
  0xad   :  { %v252_v17 = vadd.f32 %v248_v15, %v218_v14  ;;  %v260_v26 = vrot.slane %v259_v24, 1  ;;  %v420_v14 = vld [vmem:[%s796_s5] sm:$0x1] }
  0xaf   :  { %v759_v19 = vadd.f32 %v490_v1, %v252_v17  ;;  %v261_v29 = vadd.f32 %v260_v26, %v259_v24  ;;  %v422_v17 = vld [vmem:[%s797_s6] sm:$0x1] }
  0xb1   :  { %v263_v20 = vadd.f32 %v759_v19, %v757_v18 }
  0xb3   :  { %v264_v22 = vrot.slane %v263_v20, 4 }
  0xb5   :  { %v265_v23 = vadd.f32 %v264_v22, %v263_v20 }
  0xb7   :  { %v266_v25 = vrot.slane %v265_v23, 2 }
  0xb9   :  { %v267_v27 = vadd.f32 %v266_v25, %v265_v23 }
  0xbb   :  { %v268_v28 = vrot.slane %v267_v27, 1 }
  0xbd   :  { %v269_v30 = vadd.f32 %v268_v28, %v267_v27 }
  0xbf   :  { %v270_v31 = vadd.f32 %v269_v30, %v261_v29 }
  0xc1   :  { %303 = vmatmul.f32.vlgmr.msrb.gmra.mxu2 %v270_v31 }
 0x144   :  { %v304_v39 = vpop.f32.mrf.mxu2 }
 0x145   :  { %v314_v40 = vmul.f32 %v313_v38, %v304_v39 }
 0x147   :  { %487 = vmatmul.msk.f32.vlgmr.msra.gmra.mxu1 %vm316_vm2, %v314_v40 }
 0x1c4   :  { %v337_v41 = vpop.f32.mrf.mxu1 }
 0x1c5   :  { %v340_v42 = vperm.slane %v337_v41, 0 }
 0x1c7   :  { %v341_v43 = vsub.f32 %v753_v6, %v340_v42  ;;  %v342_v44 = vsub.f32 %v748_v3, %v340_v42  ;;  %v353_v45 = vsub.f32 %v757_v18, %v340_v42  ;;  %v354_v46 = vsub.f32 %v759_v19, %v340_v42 }
 0x1c9   :  { %v343_v47 = vmul.f32 %v341_v43, %v341_v43  ;;  %v344_v48 = vmul.f32 %v342_v44, %v342_v44  ;;  %v355_v49 = vmul.f32 %v353_v45, %v353_v45  ;;  %v356_v50 = vmul.f32 %v354_v46, %v354_v46 }
 0x1cb   :  { %v345_v51 = vadd.f32 %v344_v48, %v343_v47  ;;  %v357_v52 = vadd.f32 %v356_v50, %v355_v49 }
 0x1cd   :  { %v346_v53 = vrot.slane %v345_v51, 4  ;;  %v358_v54 = vrot.slane %v357_v52, 4 }
 0x1cf   :  { %v347_v55 = vadd.f32 %v346_v53, %v345_v51  ;;  %v359_v56 = vadd.f32 %v358_v54, %v357_v52 }
 0x1d1   :  { %v348_v57 = vrot.slane %v347_v55, 2  ;;  %v360_v58 = vrot.slane %v359_v56, 2 }
 0x1d3   :  { %v349_v59 = vadd.f32 %v348_v57, %v347_v55  ;;  %v361_v60 = vadd.f32 %v360_v58, %v359_v56 }
 0x1d5   :  { %v350_v61 = vrot.slane %v349_v59, 1  ;;  %v362_v62 = vrot.slane %v361_v60, 1 }
 0x1d7   :  { %v351_v63 = vadd.f32 %v350_v61, %v349_v59  ;;  %v363_v0 = vadd.f32 %v362_v62, %v361_v60 }
 0x1d9   :  { %v364_v1 = vadd.f32 %v363_v0, %v351_v63 }
 0x1db   :  { %381 = vmatmul.f32.vlgmr.msrb.gmra.mxu3 %v364_v1 }
 0x25e   :  { %v382_v2 = vpop.f32.mrf.mxu3 }
 0x25f   :  { %v385_v4 = vmul.f32 %v382_v2, %v313_v38 }
 0x261   :  { %v386_v5 = vadd.f32 1e-05, %v385_v4 }
 0x263   :  { %493 = vrsqrt.f32 %v386_v5  ;;  %vm393_vm4 = vweird.f32 %v386_v5 }
 0x269   :  { %v494_v7 = vpop.eup %493 }
 0x26a   :  { %v388_v8 = vmul.f32 %v494_v7, %v386_v5  ;;  %vm394_vm3 = vweird.f32 %v494_v7 }
 0x26b   :  { %vm395_vm5 = vmor %vm393_vm4, %vm394_vm3 }
 0x26c   :  { %v389_v9 = vmul.f32 %v494_v7, %v388_v8 }
 0x26e   :  { %v390_v10 = vmul.f32 0.5, %v389_v9 }
 0x270   :  { %v391_v11 = vsub.f32 1.5, %v390_v10 }
 0x272   :  { %v392_v12 = vmul.f32 %v494_v7, %v391_v11 }
 0x274   :  { %v396_v13 = vsel %vm395_vm5, %v494_v7, %v392_v12 }
 0x275   :  { %488 = vmatmul.msk.f32.vlgmr.msra.gmra.mxu0 %vm316_vm2, %v396_v13 }
 0x2f2   :  { %v417_v15 = vpop.f32.mrf.mxu0 }
 0x2f3   :  { %v421_v16 = vmul.f32 %v420_v14, %v417_v15 }
 0x2f5   :  { %v423_v20 = vmul.f32 %v421_v16, %v337_v41  ;;  %v426_v21 = vperm.slane %v421_v16, 0 }
 0x2f7   :  { %v424_v22 = vsub.f32 %v422_v17, %v423_v20  ;;  %v428_v23 = vmul.f32 %v426_v21, %v753_v6  ;;  %v429_v24 = vmul.f32 %v426_v21, %v748_v3  ;;  %v439_v26 = vmul.f32 %v426_v21, %v757_v18 }
 0x2f8   :  { %v440_v27 = vmul.f32 %v426_v21, %v759_v19 }
 0x2f9   :  { %v431_v25 = vperm.slane %v424_v22, 0 }
 0x2fb   :  { %v433_v28 = vadd.f32 %v431_v25, %v428_v23  ;;  %v434_v29 = vadd.f32 %v431_v25, %v429_v24  ;;  %v441_v30 = vadd.f32 %v439_v26, %v431_v25  ;;  %v442_v31 = vadd.f32 %v440_v27, %v431_v25 }
 0x2fd   :  { %v435_v32 = vmax.f32 %v433_v28, 0.0  ;;  %v436_v33 = vmax.f32 %v434_v29, 0.0  ;;  %v443_v34 = vmax.f32 %v441_v30, 0.0  ;;  %v444_v35 = vmax.f32 %v442_v31, 0.0 }
 0x2ff   :  { %437 = vst [vmem:[%s798_s7] sm:$0xff] %v435_v32 }
 0x300   :  { %438 = vst [vmem:[%s798_s7 + $0x8] sm:$0xff] %v436_v33 }
 0x301   :  { %445 = vst [vmem:[%s798_s7 + $0x10] sm:$0xff] %v443_v34 }
 0x302   :  { %446 = vst [vmem:[%s798_s7 + $0x18] sm:$0xff] %v444_v35 }

</bundles_post_ra>
